<compile_context>
chip_gen: v7x
topology: tpu7x:2x2x1
jax: 0.10.0
libtpu: 0.0.40
codegen_flags: <defaults>
</compile_context>

<pallas_src>
import functools

import jax
import jax.numpy as jnp
from jax.experimental import pallas as pl
from jax.experimental.pallas import tpu as pltpu

_LANE = 128


def _choose_tile(batch, tile):
    """Pick the batch tile (lanes) and grid size."""
    groups = pl.cdiv(batch, _LANE)                       # 128-lane groups covering batch
    tile_groups = max(1, min(tile // _LANE, groups))
    n_tiles = pl.cdiv(groups, tile_groups)
    # v7x has 2 TensorCores sharing the "parallel" grid axis: when the batch
    # spans multiple tiles, prefer an even number of balanced grid steps
    # (slightly enlarging the tile instead of leaving one odd step).
    if n_tiles > 2 and n_tiles % 2 == 1:
        tile_groups = pl.cdiv(groups, n_tiles - 1)
        n_tiles = pl.cdiv(groups, tile_groups)
    tm = tile_groups * _LANE
    return tm, n_tiles, tm * n_tiles


def _choose_chunk(tm, chunk):
    """Largest lane-chunk <= `chunk` that divides the tile (multiple of 128)."""
    tg = tm // _LANE
    cg = max(1, min(chunk // _LANE, tg))
    while tg % cg:
        cg -= 1
    return cg * _LANE


def _mlp_kernel(xt_ref, w1_ref, b1_ref, w2_ref, b2_ref, w3_ref, b3_ref, o_ref,
                *, chunk):
    # xt_ref : (input_size, TM) bf16, batch on the lane axis
    # w1_ref : (H1, input_size) bf16      b1_ref : (H1, 1) f32
    # w2_ref : (H2, H1)        bf16       b2_ref : (H2, 1) f32
    # w3_ref : (H2, 1)         f32        b3_ref : (1, 1)  f32
    # o_ref  : (1, TM)         f32  (lane-dense output row)
    w1 = w1_ref[...]
    b1 = b1_ref[...]
    w2 = w2_ref[...]
    b2 = b2_ref[...]
    w3 = w3_ref[...]
    b3 = b3_ref[...]

    def block(xc):
        # fc1 + ReLU  (MXU, f32 accumulate)
        h1 = jnp.dot(w1, xc, preferred_element_type=jnp.float32)
        h1 = jnp.maximum(h1 + b1, 0.0)                       # (H1, chunk)
        # dropout (eval mode) -> identity
        # fc2 + ReLU  (MXU, f32 accumulate; activation back to bf16 operand)
        h2 = jnp.dot(w2, h1.astype(jnp.bfloat16),
                     preferred_element_type=jnp.float32)
        h2 = jnp.maximum(h2 + b2, 0.0)                       # (H2, chunk)
        # dropout (eval mode) -> identity
        # fc3 (out features = 1): VPU multiply + sublane reduction instead of
        # a nearly-empty MXU pass.
        return jnp.sum(h2 * w3, axis=0, keepdims=True) + b3  # (1, chunk)

    tm = xt_ref.shape[1]
    n_chunks = tm // chunk
    if n_chunks == 1:
        o_ref[...] = block(xt_ref[...]).astype(o_ref.dtype)
    else:
        # Bound live intermediates: process the tile in `chunk`-lane slices.
        def body(c, carry):
            start = pl.multiple_of(c * chunk, _LANE)
            xc = xt_ref[:, pl.ds(start, chunk)]
            o_ref[:, pl.ds(start, chunk)] = block(xc).astype(o_ref.dtype)
            return carry
        jax.lax.fori_loop(0, n_chunks, body, 0)


def _forward_from_xt(xt, params, *, tile, chunk):
    """xt: (input_size, B), batch on the minor (lane) axis. Returns (1, B_pad) f32."""
    input_size, batch = xt.shape
    xt = xt.astype(jnp.bfloat16)

    tm, n_tiles, b_pad = _choose_tile(batch, tile)
    ch = _choose_chunk(tm, chunk)
    if b_pad != batch:                      # skipped entirely when already aligned
        xt = jnp.pad(xt, ((0, 0), (0, b_pad - batch)))

    # Weights in PyTorch layout (out, in); bf16 MXU operands for fc1/fc2.
    w1 = params["w1"].astype(jnp.bfloat16)          # (H1, in)
    w2 = params["w2"].astype(jnp.bfloat16)          # (H2, H1)
    b1 = params["b1"]                               # (H1, 1) f32
    b2 = params["b2"]                               # (H2, 1) f32
    w3 = params["w3"].T                             # (H2, 1) f32 column
    b3 = params["b3"]                               # (1, 1)  f32
    h1_dim, h2_dim = w1.shape[0], w2.shape[0]

    const = lambda a: pl.BlockSpec(a.shape, lambda i: (0, 0))   # VMEM-resident

    # Scheduling hint for XLA.
    flops = 2 * b_pad * (input_size * h1_dim + h1_dim * h2_dim + h2_dim)
    weight_bytes = sum(int(a.size) * a.dtype.itemsize
                       for a in (w1, b1, w2, b2, w3, b3))
    bytes_accessed = int(xt.size) * 2 + b_pad * 4 + weight_bytes
    cost = pl.CostEstimate(flops=flops, transcendentals=0,
                           bytes_accessed=bytes_accessed)

    # Only raise the scoped-VMEM limit when the per-step footprint needs it
    # (v5e default ~16 MiB); cap well under v7x's 64 MiB physical VMEM.
    est_vmem = (2 * input_size * tm * 2          # double-buffered x tile (bf16)
                + 2 * tm * 4                     # double-buffered out tile (f32)
                + 2 * weight_bytes               # weights/biases
                + 2 * (h1_dim + h2_dim) * ch * 4)  # headroom for f32 temps
    cparams = dict(dimension_semantics=("parallel",))
    if est_vmem > 12 * 1024 * 1024:
        cparams["vmem_limit_bytes"] = min(est_vmem * 3 // 2, 48 * 1024 * 1024)

    return pl.pallas_call(
        functools.partial(_mlp_kernel, chunk=ch),
        out_shape=jax.ShapeDtypeStruct((1, b_pad), jnp.float32),
        grid_spec=pltpu.PrefetchScalarGridSpec(
            num_scalar_prefetch=0,
            grid=(n_tiles,),
            in_specs=[
                pl.BlockSpec((input_size, tm), lambda i: (0, i)),   # x tile
                const(w1), const(b1),                               # resident
                const(w2), const(b2),
                const(w3), const(b3),
            ],
            out_specs=pl.BlockSpec((1, tm), lambda i: (0, i)),      # lane-dense
        ),
        compiler_params=pltpu.CompilerParams(**cparams),
        cost_estimate=cost,
    )(xt, w1, b1, w2, b2, w3, b3)


@functools.partial(jax.jit, static_argnames=("tile", "chunk"))
def route_efficiency_forward(x, params, *, tile=8192, chunk=2048):
    """x: (B, input_size) float32; params in PyTorch (out, in) layout. Returns (B, 1)."""
    batch = x.shape[0]
    # Single fused layout pass (transpose + bf16 convert, pad only if needed);
    # kept inside the jit so XLA emits one copy. If the transposed activations
    # are reused across calls, use route_efficiency_forward_xt instead.
    xt = x.T.astype(jnp.bfloat16)
    out = _forward_from_xt(xt, params, tile=tile, chunk=chunk)
    return out[0, :batch].reshape(batch, 1)


@functools.partial(jax.jit, static_argnames=("tile", "chunk"))
def route_efficiency_forward_xt(xt, params, *, tile=8192, chunk=2048):
    """Entry point for callers that already hold x as (input_size, B) (e.g. cached):
    skips the wrapper layout pass entirely."""
    batch = xt.shape[1]
    out = _forward_from_xt(xt, params, tile=tile, chunk=chunk)
    return out[0, :batch].reshape(batch, 1)


def init_params(key, input_size, hidden_size=64):
    """Deterministic init mimicking nn.Linear's U(-1/sqrt(fan_in), 1/sqrt(fan_in))."""
    ks = jax.random.split(key, 6)

    def linear(kw, kb, fan_in, fan_out):
        bound = 1.0 / jnp.sqrt(jnp.float32(fan_in))
        # PyTorch layout: weight (out, in), bias stored as a column (out, 1).
        w = jax.random.uniform(kw, (fan_out, fan_in), jnp.float32, -bound, bound)
        b = jax.random.uniform(kb, (fan_out, 1), jnp.float32, -bound, bound)
        return w, b

    w1, b1 = linear(ks[0], ks[1], input_size, hidden_size)
    w2, b2 = linear(ks[2], ks[3], hidden_size, hidden_size // 2)
    w3, b3 = linear(ks[4], ks[5], hidden_size // 2, 1)
    return {"w1": w1, "b1": b1, "w2": w2, "b2": b2, "w3": w3, "b3": b3}


def reference_forward(x, params):
    """Pure-JAX f32 reference of the PyTorch forward (eval mode)."""
    h1 = jnp.maximum(x @ params["w1"].T + params["b1"].T, 0.0)
    h2 = jnp.maximum(h1 @ params["w2"].T + params["b2"].T, 0.0)
    return h2 @ params["w3"].T + params["b3"].T


if __name__ == "__main__":
    key = jax.random.PRNGKey(0)
    k_x, k_x2, k_p = jax.random.split(key, 3)

    input_size = 16
    hidden_size = 64
    params = init_params(k_p, input_size, hidden_size)

    # Case 1: small batch, single tile / single chunk path.
    batch = 8
    x = jax.random.normal(k_x, (batch, input_size), jnp.float32)
    out = jax.block_until_ready(route_efficiency_forward(x, params))
    ref = reference_forward(x, params)
    assert out.shape == (batch, 1), out.shape
    assert jnp.allclose(out, ref, atol=5e-2, rtol=5e-2), "mismatch (small batch)"

    # Case 2: non-multiple batch with tiny tile/chunk overrides to exercise the
    # multi-tile grid (even-step heuristic) and the inner fori_loop chunk path.
    batch2 = 600
    x2 = jax.random.normal(k_x2, (batch2, input_size), jnp.float32)
    out2 = jax.block_until_ready(
        route_efficiency_forward(x2, params, tile=256, chunk=128))
    ref2 = reference_forward(x2, params)
    assert out2.shape == (batch2, 1), out2.shape
    assert jnp.allclose(out2, ref2, atol=5e-2, rtol=5e-2), "mismatch (tiled/chunked)"

    # Case 3: same batch with default (large) tile -> single tile, single chunk.
    out3 = jax.block_until_ready(route_efficiency_forward(x2, params))
    assert out3.shape == (batch2, 1), out3.shape
    assert jnp.allclose(out3, ref2, atol=5e-2, rtol=5e-2), "mismatch (default tile)"

    print("KERNEL_OK")
</pallas_src>

<mosaic_0001>
module attributes {stable_mosaic.version = 11 : i64} {
  func.func @_mlp_kernel(%arg0: i32, %arg1: memref<16x128xbf16, #tpu.memory_space<vmem>>, %arg2: memref<64x16xbf16, #tpu.memory_space<vmem>>, %arg3: memref<64x1xf32, #tpu.memory_space<vmem>>, %arg4: memref<32x64xbf16, #tpu.memory_space<vmem>>, %arg5: memref<32x1xf32, #tpu.memory_space<vmem>>, %arg6: memref<32x1xf32, #tpu.memory_space<vmem>>, %arg7: memref<1x1xf32, #tpu.memory_space<vmem>>, %arg8: memref<1x128xf32, #tpu.memory_space<vmem>>) attributes {dimension_semantics = [#tpu.dimension_semantics<parallel>], iteration_bounds = array<i64: 1>, scalar_prefetch = 0 : i64, scratch_operands = 0 : i64, tpu.core_type = #tpu.core_type<tc>, window_params = [{transform_indices = @transform_0, window_bounds = array<i64: 16, 128>}, {pipeline_mode = #tpu.pipeline_mode<synchronous>, transform_indices = @transform_1, window_bounds = array<i64: 64, 16>}, {pipeline_mode = #tpu.pipeline_mode<synchronous>, transform_indices = @transform_2, window_bounds = array<i64: 64, 1>}, {pipeline_mode = #tpu.pipeline_mode<synchronous>, transform_indices = @transform_3, window_bounds = array<i64: 32, 64>}, {pipeline_mode = #tpu.pipeline_mode<synchronous>, transform_indices = @transform_4, window_bounds = array<i64: 32, 1>}, {pipeline_mode = #tpu.pipeline_mode<synchronous>, transform_indices = @transform_5, window_bounds = array<i64: 32, 1>}, {pipeline_mode = #tpu.pipeline_mode<synchronous>, transform_indices = @transform_6, window_bounds = array<i64: 1, 1>}, {transform_indices = @transform_7, window_bounds = array<i64: 1, 128>}]} {
    %c0 = arith.constant 0 : index
    %c0_0 = arith.constant 0 : index
    %0 = vector.load %arg2[%c0, %c0_0] : memref<64x16xbf16, #tpu.memory_space<vmem>>, vector<64x16xbf16>
    %c0_1 = arith.constant 0 : index
    %c0_2 = arith.constant 0 : index
    %1 = vector.load %arg3[%c0_1, %c0_2] : memref<64x1xf32, #tpu.memory_space<vmem>>, vector<64x1xf32>
    %c0_3 = arith.constant 0 : index
    %c0_4 = arith.constant 0 : index
    %2 = vector.load %arg4[%c0_3, %c0_4] : memref<32x64xbf16, #tpu.memory_space<vmem>>, vector<32x64xbf16>
    %c0_5 = arith.constant 0 : index
    %c0_6 = arith.constant 0 : index
    %3 = vector.load %arg5[%c0_5, %c0_6] : memref<32x1xf32, #tpu.memory_space<vmem>>, vector<32x1xf32>
    %c0_7 = arith.constant 0 : index
    %c0_8 = arith.constant 0 : index
    %4 = vector.load %arg6[%c0_7, %c0_8] : memref<32x1xf32, #tpu.memory_space<vmem>>, vector<32x1xf32>
    %c0_9 = arith.constant 0 : index
    %c0_10 = arith.constant 0 : index
    %5 = vector.load %arg7[%c0_9, %c0_10] : memref<1x1xf32, #tpu.memory_space<vmem>>, vector<1x1xf32>
    %c0_11 = arith.constant 0 : index
    %c0_12 = arith.constant 0 : index
    %6 = vector.load %arg1[%c0_11, %c0_12] : memref<16x128xbf16, #tpu.memory_space<vmem>>, vector<16x128xbf16>
    %cst = arith.constant dense<0.000000e+00> : vector<64x128xf32>
    %7 = tpu.matmul %0, %6, %cst {dimension_numbers = #tpu.dot_dimension_numbers<[1], [0], [0], [1], [0, 0, 1, 1], [], []>} : vector<64x16xbf16>, vector<16x128xbf16>, vector<64x128xf32> -> vector<64x128xf32>
    %8 = vector.broadcast %1 : vector<64x1xf32> to vector<64x128xf32>
    %9 = arith.addf %7, %8 : vector<64x128xf32>
    %cst_13 = arith.constant 0.000000e+00 : f32
    %10 = vector.broadcast %cst_13 : f32 to vector<64x128xf32>
    %11 = arith.maximumf %9, %10 : vector<64x128xf32>
    %12 = arith.truncf %11 : vector<64x128xf32> to vector<64x128xbf16>
    %cst_14 = arith.constant dense<0.000000e+00> : vector<32x128xf32>
    %13 = tpu.matmul %2, %12, %cst_14 {dimension_numbers = #tpu.dot_dimension_numbers<[1], [0], [0], [1], [0, 0, 1, 1], [], []>} : vector<32x64xbf16>, vector<64x128xbf16>, vector<32x128xf32> -> vector<32x128xf32>
    %14 = vector.broadcast %3 : vector<32x1xf32> to vector<32x128xf32>
    %15 = arith.addf %13, %14 : vector<32x128xf32>
    %cst_15 = arith.constant 0.000000e+00 : f32
    %16 = vector.broadcast %cst_15 : f32 to vector<32x128xf32>
    %17 = arith.maximumf %15, %16 : vector<32x128xf32>
    %18 = vector.broadcast %4 : vector<32x1xf32> to vector<32x128xf32>
    %19 = arith.mulf %17, %18 : vector<32x128xf32>
    %cst_16 = arith.constant dense<0.000000e+00> : vector<128xf32>
    %20 = vector.multi_reduction <add>, %19, %cst_16 [0] : vector<32x128xf32> to vector<128xf32>
    %21 = vector.shape_cast %20 : vector<128xf32> to vector<1x128xf32>
    %22 = vector.broadcast %5 : vector<1x1xf32> to vector<1x128xf32>
    %23 = arith.addf %21, %22 : vector<1x128xf32>
    %c0_17 = arith.constant 0 : index
    %c0_18 = arith.constant 0 : index
    %24 = vector.load %arg8[%c0_17, %c0_18] : memref<1x128xf32, #tpu.memory_space<vmem>>, vector<1x128xf32>
    tpu.vector_store %arg8[%c0_17, %c0_18], %23 {strides = array<i32>} : memref<1x128xf32, #tpu.memory_space<vmem>>, vector<1x128xf32>,
    return
  }
  func.func @transform_0(%arg0: i32) -> (i32, i32) {
    %c0_i32 = arith.constant 0 : i32
    %c0_i32_0 = arith.constant 0 : i32
    return %c0_i32, %arg0 : i32, i32
  }
  func.func @transform_1(%arg0: i32) -> (i32, i32) {
    %c0_i32 = arith.constant 0 : i32
    %c0_i32_0 = arith.constant 0 : i32
    %c0_i32_1 = arith.constant 0 : i32
    return %c0_i32, %c0_i32_0 : i32, i32
  }
  func.func @transform_2(%arg0: i32) -> (i32, i32) {
    %c0_i32 = arith.constant 0 : i32
    %c0_i32_0 = arith.constant 0 : i32
    %c0_i32_1 = arith.constant 0 : i32
    return %c0_i32, %c0_i32_0 : i32, i32
  }
  func.func @transform_3(%arg0: i32) -> (i32, i32) {
    %c0_i32 = arith.constant 0 : i32
    %c0_i32_0 = arith.constant 0 : i32
    %c0_i32_1 = arith.constant 0 : i32
    return %c0_i32, %c0_i32_0 : i32, i32
  }
  func.func @transform_4(%arg0: i32) -> (i32, i32) {
    %c0_i32 = arith.constant 0 : i32
    %c0_i32_0 = arith.constant 0 : i32
    %c0_i32_1 = arith.constant 0 : i32
    return %c0_i32, %c0_i32_0 : i32, i32
  }
  func.func @transform_5(%arg0: i32) -> (i32, i32) {
    %c0_i32 = arith.constant 0 : i32
    %c0_i32_0 = arith.constant 0 : i32
    %c0_i32_1 = arith.constant 0 : i32
    return %c0_i32, %c0_i32_0 : i32, i32
  }
  func.func @transform_6(%arg0: i32) -> (i32, i32) {
    %c0_i32 = arith.constant 0 : i32
    %c0_i32_0 = arith.constant 0 : i32
    %c0_i32_1 = arith.constant 0 : i32
    return %c0_i32, %c0_i32_0 : i32, i32
  }
  func.func @transform_7(%arg0: i32) -> (i32, i32) {
    %c0_i32 = arith.constant 0 : i32
    %c0_i32_0 = arith.constant 0 : i32
    return %c0_i32, %arg0 : i32, i32
  }
}

</mosaic_0001>

<bundles_post_ra>
// kernel: route_efficiency_forward.1
= control target key start
LH: loop header
LB: loop body
LE: loop exit
PB: predicated region body
PF: predicated region fallthrough
CT: control target
= control target key end

     0   :  { %vm126_vm0 = vcmask 130048   ;;  %v410_v1 = vmov 0   ;;  %vm246_vm1 = vcmask 523264   ;;  %s532_s0 = inlined_call_operand.vmem [shape: bf16[16,128], index: 0, kind: input, shape index: {}]   ;;  %s533_s1 = inlined_call_operand.vmem [shape: bf16[64,16], index: 1, kind: input, shape index: {}]   ;;  %s534_s6 = inlined_call_operand.<no memory space> [shape: f32[1,1], index: 6, kind: input, shape index: {}]   ;;  %s535_s2 = inlined_call_operand.vmem [shape: f32[64,1], index: 2, kind: input, shape index: {}]   ;;  %s536_s4 = inlined_call_operand.vmem [shape: f32[32,1], index: 4, kind: input, shape index: {}]   ;;  %s537_s5 = inlined_call_operand.vmem [shape: f32[32,1], index: 5, kind: input, shape index: {}]   ;;  %s538_s3 = inlined_call_operand.vmem [shape: bf16[32,64], index: 3, kind: input, shape index: {}]   ;;  %s539_s7 = inlined_call_operand.vmem [shape: f32[1,128], index: 7, kind: output, shape index: {}]  }
   0x1   :  { %v403_v0 = vld [vmem:[%s532_s0] sm:$0xff]   ;;  %401 = vset.pattern.permute.xlu0 %v410_v1  ;;  %402 = vset.pattern.permute.xlu1 %v410_v1  ;;  %v12_v2 = vstv %s534_s6  ;;  %v405_v4 = vld [vmem:[%s533_s1 + $0x8] sm:$0xff]   ;;  %v406_v5 = vld [vmem:[%s533_s1 + $0x10] sm:$0xff]  }
   0x2   :  { %v404_v3 = vld [vmem:[%s533_s1] sm:$0xff]   ;;  %13 = vst [vmem:[#allocation2] sm:$0x1] %v12_v2  ;;  %378 = vmatprep.subr.bf16.mxu0 %v403_v0  ;;  %v39_v7 = vld [vmem:[%s535_s2 + $0x10] sm:$0xff]  ;;  %v38_v8 = vld [vmem:[%s535_s2 + $0x8] sm:$0xff] }
   0x3   :  { %379 = vmatpush3.bf16.msra.mxu0 %v403_v0  ;;  %380 = vmatprep.mubr.msk.bf16.mxu0 %vm126_vm0, %v404_v3  ;;  %v37_v6 = vld [vmem:[%s535_s2] sm:$0xff]  ;;  %v40_v9 = vld [vmem:[%s535_s2 + $0x18] sm:$0xff]  ;;  %v42_v12 = vld [vmem:[%s535_s2 + $0x28] sm:$0xff] }
   0x4   :  { %62 = vperm.xlu0 %401, %v37_v6   ;;  %72 = vperm.xlu1 %402, %v39_v7   ;;  %v407_v10 = vld [vmem:[%s533_s1 + $0x18] sm:$0xff]   ;;  %v41_v11 = vld [vmem:[%s535_s2 + $0x20] sm:$0xff]  ;;  %v43_v13 = vld [vmem:[%s535_s2 + $0x30] sm:$0xff] }
   0x5   :  { %v44_v14 = vld [vmem:[%s535_s2 + $0x38] sm:$0xff]  ;;  %v49_v15 = vld [vmem:[%s536_s4] sm:$0xff]  ;;  %v50_v16 = vld [vmem:[%s536_s4 + $0x8] sm:$0xff] }
   0x6   :  { %381 = vmatmul.mubr.msk.bf16.vlgmr.msra.gmra.mrb[0].mxu0 %vm126_vm0, %v405_v4  ;;  %v51_v17 = vld [vmem:[%s536_s4 + $0x10] sm:$0xff]  ;;  %v52_v18 = vld [vmem:[%s536_s4 + $0x18] sm:$0xff]  ;;  %v53_v19 = vld [vmem:[%s537_s5] sm:$0xff] }
   0x7   :  { %384 = vmatprep.mubr.msk.bf16.mxu0 %vm126_vm0, %v406_v5  ;;  %v54_v20 = vld [vmem:[%s537_s5 + $0x8] sm:$0xff]  ;;  %v55_v21 = vld [vmem:[%s537_s5 + $0x10] sm:$0xff]  ;;  %v56_v22 = vld [vmem:[%s537_s5 + $0x18] sm:$0xff] }
   0x8   :  { %67 = vperm.xlu0 %401, %v38_v8   ;;  %77 = vperm.xlu1 %402, %v40_v9   ;;  %v408_v24 = vld [vmem:[%s538_s3] sm:$0xff]   ;;  %v409_v61 = vld [vmem:[%s538_s3 + $0x8] sm:$0xff]  }
   0x9   :  { %v57_v23 = vld [vmem:[#allocation2] sm:$0x1]  ;;  %396 = vmatprep.mubr.msk.bf16.mxu1 %vm246_vm1, %v408_v24  ;;  %v344_v24 = vlaneseq }
   0xc   :  { %82 = vperm.xlu0 %401, %v41_v11   ;;  %87 = vperm.xlu1 %402, %v42_v12  }
   0xe   :  { %385 = vmatmul.mubr.msk.bf16.gmra.mrb[4].mxu0 %vm126_vm0, %v407_v10 }
  0x10   :  { %92 = vperm.xlu0 %401, %v43_v13   ;;  %97 = vperm.xlu1 %402, %v44_v14  }
  0x14   :  { %218 = vperm.xlu0 %401, %v49_v15   ;;  %223 = vperm.xlu1 %402, %v50_v16  }
  0x18   :  { %228 = vperm.xlu0 %401, %v51_v17   ;;  %233 = vperm.xlu1 %402, %v52_v18  }
  0x1c   :  { %308 = vperm.xlu0 %401, %v53_v19   ;;  %313 = vperm.xlu1 %402, %v54_v20  }
  0x20   :  { %318 = vperm.xlu0 %401, %v55_v21   ;;  %323 = vperm.xlu1 %402, %v56_v22  }
  0x24   :  { %341 = vperm.xlu0 %401, %v57_v23  }
  0x83   :  { %v63_v25 = vpop.permute.xlu0 %62  ;;  %v73_v26 = vpop.permute.xlu1 %72 }
  0x87   :  { %v68_v27 = vpop.permute.xlu0 %67  ;;  %v78_v28 = vpop.permute.xlu1 %77 }
  0x8b   :  { %v83_v32 = vpop.permute.xlu0 %82  ;;  %v88_v37 = vpop.permute.xlu1 %87 }
  0x8f   :  { %v93_v44 = vpop.permute.xlu0 %92  ;;  %v98_v49 = vpop.permute.xlu1 %97 }
  0x93   :  { %v219_v62 = vpop.permute.xlu0 %218  ;;  %v224_v63 = vpop.permute.xlu1 %223 }
  0x97   :  { %v229_v0 = vpop.permute.xlu0 %228  ;;  %v234_v1 = vpop.permute.xlu1 %233 }
  0x9b   :  { %v309_v7 = vpop.permute.xlu0 %308  ;;  %v314_v12 = vpop.permute.xlu1 %313 }
  0x9f   :  { %v319_v18 = vpop.permute.xlu0 %318  ;;  %v324_v21 = vpop.permute.xlu1 %323 }
  0xd9   :  { %v382_v29 = vpop.f32.mrb[0].mxu0 }
  0xda   :  { %v182_v30 = vadd.f32 %v382_v29, %v73_v26  ;;  %v173_v31 = vpop.f32.mrb[1].mxu0 }
  0xdb   :  { %v174_v33 = vadd.f32 %v173_v31, %v63_v25  ;;  %v383_v34 = vpop.f32.mrb[2].mxu0 }
  0xdc   :  { %v185_v35 = vadd.f32 %v383_v34, %v78_v28  ;;  %v176_v36 = vpop.f32.mrb[3].mxu0  ;;  %v206_v39 = vmax.f32 %v182_v30, 0.0 }
  0xdd   :  { %v177_v38 = vadd.f32 %v176_v36, %v68_v27  ;;  %v204_v41 = vmax.f32 %v174_v33, 0.0  ;;  %v345_v27 = vshrl.u32 %v344_v24, 7 }
  0xde   :  { %v207_v40 = vmax.f32 %v185_v35, 0.0 }
  0xdf   :  { %v205_v42 = vmax.f32 %v177_v38, 0.0  ;;  %v346_v30 = vsub.s32 0, %v345_v27 }
  0xe0   :  { %v213_v43 = vpack.c.bf16 %v207_v40, %v206_v39 }
  0xe1   :  { %v386_v45 = vpop.f32.mrb[4].mxu0  ;;  %v212_v46 = vpack.c.bf16 %v205_v42, %v204_v41 }
  0xe2   :  { %v198_v47 = vadd.f32 %v386_v45, %v93_v44  ;;  %v189_v48 = vpop.f32.mrb[5].mxu0 }
  0xe3   :  { %v190_v50 = vadd.f32 %v189_v48, %v83_v32  ;;  %v387_v51 = vpop.f32.mrb[6].mxu0  ;;  %388 = vmatprep.subr.bf16.mxu1 %v212_v46  ;;  %v342_v32 = vpop.permute.xlu0 %341 }
  0xe4   :  { %v201_v52 = vadd.f32 %v387_v51, %v98_v49  ;;  %v192_v53 = vpop.f32.mrb[7].mxu0  ;;  %389 = vmatpush3.bf16.msra.mxu1 %v212_v46  ;;  %v210_v55 = vmax.f32 %v198_v47, 0.0  ;;  %v347_v34 = vrot.slane %v342_v32, %v346_v30 }
  0xe5   :  { %v193_v54 = vadd.f32 %v192_v53, %v88_v37  ;;  %390 = vmatprep.subr.bf16.mxu1 %v213_v43  ;;  %v208_v57 = vmax.f32 %v190_v50, 0.0 }
  0xe6   :  { %v211_v56 = vmax.f32 %v201_v52, 0.0 }
  0xe7   :  { %v209_v58 = vmax.f32 %v193_v54, 0.0 }
  0xe8   :  { %v215_v59 = vpack.c.bf16 %v211_v56, %v210_v55  ;;  %391 = vmatpush3.bf16.msra.mxu1 %v213_v43 }
  0xe9   :  { %v214_v60 = vpack.c.bf16 %v209_v58, %v208_v57 }
  0xeb   :  { %392 = vmatprep.subr.bf16.mxu1 %v214_v60 }
  0xec   :  { %393 = vmatpush3.bf16.msra.mxu1 %v214_v60 }
  0xed   :  { %394 = vmatprep.subr.bf16.mxu1 %v215_v59 }
  0xf0   :  { %395 = vmatpush3.bf16.msra.mxu1 %v215_v59 }
  0xf3   :  { %397 = vmatmul.mubr.msk.bf16.vlgmr.msra.gmra.mrb[0].mxu1 %vm246_vm1, %v409_v61 }
 0x1c6   :  { %v398_v2 = vpop.f32.mrb[0].mxu1 }
 0x1c7   :  { %v287_v3 = vpop.f32.mrb[1].mxu1  ;;  %v296_v4 = vadd.f32 %v398_v2, %v229_v0 }
 0x1c8   :  { %v288_v5 = vadd.f32 %v287_v3, %v219_v62  ;;  %v399_v6 = vpop.f32.mrb[2].mxu1 }
 0x1c9   :  { %v290_v8 = vpop.f32.mrb[3].mxu1  ;;  %v299_v10 = vadd.f32 %v399_v6, %v234_v1  ;;  %v304_v13 = vmax.f32 %v296_v4, 0.0 }
 0x1ca   :  { %v302_v9 = vmax.f32 %v288_v5, 0.0  ;;  %v291_v11 = vadd.f32 %v290_v8, %v224_v63 }
 0x1cb   :  { %v305_v16 = vmax.f32 %v299_v10, 0.0  ;;  %v328_v19 = vmul.f32 %v319_v18, %v304_v13 }
 0x1cc   :  { %v303_v14 = vmax.f32 %v291_v11, 0.0  ;;  %v326_v15 = vmul.f32 %v309_v7, %v302_v9 }
 0x1cd   :  { %v329_v22 = vmul.f32 %v324_v21, %v305_v16 }
 0x1ce   :  { %v327_v17 = vmul.f32 %v314_v12, %v303_v14 }
 0x1d0   :  { %v330_v20 = vadd.f32 %v327_v17, %v326_v15 }
 0x1d2   :  { %v331_v23 = vadd.f32 %v330_v20, %v328_v19 }
 0x1d4   :  { %v332_v25 = vadd.f32 %v331_v23, %v329_v22 }
 0x1d6   :  { %v333_v26 = vrot.slane %v332_v25, 4 }
 0x1d8   :  { %v334_v28 = vadd.f32 %v333_v26, %v332_v25 }
 0x1da   :  { %v335_v29 = vrot.slane %v334_v28, 2 }
 0x1dc   :  { %v336_v31 = vadd.f32 %v335_v29, %v334_v28 }
 0x1de   :  { %v337_v33 = vrot.slane %v336_v31, 1 }
 0x1e0   :  { %v338_v35 = vadd.f32 %v337_v33, %v336_v31 }
 0x1e2   :  { %v348_v36 = vadd.f32 %v347_v34, %v338_v35 }
 0x1e4   :  { %349 = vst [vmem:[%s539_s7] sm:$0x1] %v348_v36 }

</bundles_post_ra>
